<compile_context>
chip_gen: v5e
topology: v5e:2x2
jax: 0.10.0
libtpu: 0.0.40
codegen_flags: <defaults>
</compile_context>

<pallas_src>
import jax
import jax.numpy as jnp
from jax import lax
from jax.experimental import pallas as pl
from jax.experimental.pallas import tpu as pltpu


# ----------------------------------------------------------------------------
# Pallas kernel: whole RealNVP forward (all flows) per batch tile
# ----------------------------------------------------------------------------
def realnvp_kernel(x_ref,
                   w1, b1, w2, b2, w3, b3, w4, b4, w5, b5,
                   wst, bst,
                   out_x_ref, out_ld_ref):
    n_half = out_ld_ref.shape[1]
    n_flows = w1.shape[0]

    x = x_ref[...].astype(jnp.float32)
    x_a = x[:, :n_half]
    x_b = x[:, n_half:]
    ld0 = jnp.zeros_like(x_a)

    def flow_body(i, carry):
        a, b, ld = carry

        def lin(h, w_ref, b_ref):
            # w_ref[i]: (din, dout), b_ref[i]: (dout,)
            return (jnp.dot(h, w_ref[i], preferred_element_type=jnp.float32)
                    + b_ref[i])

        # FlowMLP.fc : 5 x (Linear + ReLU)
        h = jnp.maximum(lin(a, w1, b1), 0.0)
        h = jnp.maximum(lin(h, w2, b2), 0.0)
        h = jnp.maximum(lin(h, w3, b3), 0.0)
        h = jnp.maximum(lin(h, w4, b4), 0.0)
        h = jnp.maximum(lin(h, w5, b5), 0.0)
        # Dropout(p=0.2): identity in eval mode.
        # TODO(synk): training-mode dropout (random mask) not implemented.

        # Fused fc_s || fc_t head: one matmul, then split.
        st = lin(h, wst, bst)
        s = jnp.tanh(st[:, :n_half])
        t = st[:, n_half:]

        # Affine coupling:  x_b' = exp(s) * x_b + t ;  x <- concat([x_b', x_a])
        # (role swap is free: it is just a carry permutation, no VMEM writes)
        new_a = jnp.exp(s) * b + t
        new_b = a
        return new_a, new_b, ld + s

    x_a, x_b, ld = lax.fori_loop(0, n_flows, flow_body,
                                 (x_a, x_b, ld0), unroll=True)

    out_x_ref[...] = jnp.concatenate([x_a, x_b], axis=1).astype(out_x_ref.dtype)
    out_ld_ref[...] = ld.astype(out_ld_ref.dtype)


# ----------------------------------------------------------------------------
# Wrapper
# ----------------------------------------------------------------------------
def _pick_batch_tile(B):
    for tb in (512, 256, 128):
        if B % tb == 0:
            return tb
    return B


def realnvp_forward(x, params):
    """x: (B, data_dim).  params: dict of stacked per-flow weights."""
    B, data_dim = x.shape
    n_flows, n_half, n_hidden = params["w1"].shape
    assert data_dim == 2 * n_half

    # Fuse the s/t heads once in the wrapper.
    wst = jnp.concatenate([params["ws"], params["wt"]], axis=2)   # (F, H, 2*n_half)
    bst = jnp.concatenate([params["bs"], params["bt"]], axis=1)   # (F, 2*n_half)

    tb = _pick_batch_tile(B)
    grid = (B // tb,)

    def full3(arr):
        return pl.BlockSpec(arr.shape, lambda b: (0, 0, 0))

    def full2(arr):
        return pl.BlockSpec(arr.shape, lambda b: (0, 0))

    in_specs = [
        pl.BlockSpec((tb, data_dim), lambda b: (b, 0)),
        full3(params["w1"]), full2(params["b1"]),
        full3(params["w2"]), full2(params["b2"]),
        full3(params["w3"]), full2(params["b3"]),
        full3(params["w4"]), full2(params["b4"]),
        full3(params["w5"]), full2(params["b5"]),
        full3(wst), full2(bst),
    ]
    out_specs = [
        pl.BlockSpec((tb, data_dim), lambda b: (b, 0)),
        pl.BlockSpec((tb, n_half), lambda b: (b, 0)),
    ]

    grid_spec = pltpu.PrefetchScalarGridSpec(
        num_scalar_prefetch=0,
        grid=grid,
        in_specs=in_specs,
        out_specs=out_specs,
    )

    out_shape = (
        jax.ShapeDtypeStruct((B, data_dim), x.dtype),
        jax.ShapeDtypeStruct((B, n_half), jnp.float32),
    )

    call = pl.pallas_call(
        realnvp_kernel,
        grid_spec=grid_spec,
        out_shape=out_shape,
        compiler_params=pltpu.CompilerParams(
            dimension_semantics=("parallel",)),
    )
    return call(
        x,
        params["w1"], params["b1"],
        params["w2"], params["b2"],
        params["w3"], params["b3"],
        params["w4"], params["b4"],
        params["w5"], params["b5"],
        wst, bst,
    )


# ----------------------------------------------------------------------------
# Pure-JAX reference (mirrors the PyTorch forward, dropout in eval mode)
# ----------------------------------------------------------------------------
def realnvp_reference(x, params, n_flows, n_half):
    ld = jnp.zeros((x.shape[0], n_half), jnp.float32)
    for i in range(n_flows):
        x_a = x[:, :n_half]
        x_b = x[:, n_half:]
        h = x_a
        for wn, bn in (("w1", "b1"), ("w2", "b2"), ("w3", "b3"),
                       ("w4", "b4"), ("w5", "b5")):
            h = jax.nn.relu(h @ params[wn][i] + params[bn][i])
        s = jnp.tanh(h @ params["ws"][i] + params["bs"][i])
        t = h @ params["wt"][i] + params["bt"][i]
        x_b = jnp.exp(s) * x_b + t
        x = jnp.concatenate([x_b, x_a], axis=1)
        ld = ld + s
    return x, ld


# ----------------------------------------------------------------------------
# Deterministic parameter init (PyTorch-Linear-style uniform)
# ----------------------------------------------------------------------------
def init_params(key, n_flows, n_half, n_hidden):
    def uinit(k, shape, fan_in):
        bound = 1.0 / jnp.sqrt(fan_in)
        return jax.random.uniform(k, shape, jnp.float32, -bound, bound)

    keys = jax.random.split(key, 14)
    p = {}
    p["w1"] = uinit(keys[0], (n_flows, n_half, n_hidden), n_half)
    p["b1"] = uinit(keys[1], (n_flows, n_hidden), n_half)
    for j, name in enumerate(["2", "3", "4", "5"]):
        p["w" + name] = uinit(keys[2 + 2 * j], (n_flows, n_hidden, n_hidden), n_hidden)
        p["b" + name] = uinit(keys[3 + 2 * j], (n_flows, n_hidden), n_hidden)
    p["ws"] = uinit(keys[10], (n_flows, n_hidden, n_half), n_hidden)
    p["bs"] = uinit(keys[11], (n_flows, n_half), n_hidden)
    p["wt"] = uinit(keys[12], (n_flows, n_hidden, n_half), n_hidden)
    p["bt"] = uinit(keys[13], (n_flows, n_half), n_hidden)
    return p


if __name__ == "__main__":
    n_flows = 4
    data_dim = 8          # must be even; n_half = 4
    n_hidden = 32
    batch = 8

    key = jax.random.PRNGKey(0)
    k_x, k_p = jax.random.split(key)
    x = jax.random.normal(k_x, (batch, data_dim), jnp.float32)
    params = init_params(k_p, n_flows, data_dim // 2, n_hidden)

    z, log_det = realnvp_forward(x, params)
    z = jax.block_until_ready(z)
    log_det = jax.block_until_ready(log_det)

    z_ref, ld_ref = realnvp_reference(x, params, n_flows, data_dim // 2)
    assert jnp.allclose(z, z_ref, atol=1e-5, rtol=1e-5), "z mismatch"
    assert jnp.allclose(log_det, ld_ref, atol=1e-5, rtol=1e-5), "log_det mismatch"

    print("KERNEL_OK")
</pallas_src>

<mosaic_0001>
module attributes {stable_mosaic.version = 11 : i64} {
  func.func @realnvp_kernel(%arg0: i32, %arg1: memref<8x8xf32, #tpu.memory_space<vmem>>, %arg2: memref<4x4x32xf32, #tpu.memory_space<vmem>>, %arg3: memref<4x32xf32, #tpu.memory_space<vmem>>, %arg4: memref<4x32x32xf32, #tpu.memory_space<vmem>>, %arg5: memref<4x32xf32, #tpu.memory_space<vmem>>, %arg6: memref<4x32x32xf32, #tpu.memory_space<vmem>>, %arg7: memref<4x32xf32, #tpu.memory_space<vmem>>, %arg8: memref<4x32x32xf32, #tpu.memory_space<vmem>>, %arg9: memref<4x32xf32, #tpu.memory_space<vmem>>, %arg10: memref<4x32x32xf32, #tpu.memory_space<vmem>>, %arg11: memref<4x32xf32, #tpu.memory_space<vmem>>, %arg12: memref<4x32x8xf32, #tpu.memory_space<vmem>>, %arg13: memref<4x8xf32, #tpu.memory_space<vmem>>, %arg14: memref<8x8xf32, #tpu.memory_space<vmem>>, %arg15: memref<8x4xf32, #tpu.memory_space<vmem>>) attributes {dimension_semantics = [#tpu.dimension_semantics<parallel>], iteration_bounds = array<i64: 1>, scalar_prefetch = 0 : i64, scratch_operands = 0 : i64, tpu.core_type = #tpu.core_type<tc>, window_params = [{transform_indices = @transform_0, window_bounds = array<i64: 8, 8>}, {pipeline_mode = #tpu.pipeline_mode<synchronous>, transform_indices = @transform_1, window_bounds = array<i64: 4, 4, 32>}, {pipeline_mode = #tpu.pipeline_mode<synchronous>, transform_indices = @transform_2, window_bounds = array<i64: 4, 32>}, {pipeline_mode = #tpu.pipeline_mode<synchronous>, transform_indices = @transform_3, window_bounds = array<i64: 4, 32, 32>}, {pipeline_mode = #tpu.pipeline_mode<synchronous>, transform_indices = @transform_4, window_bounds = array<i64: 4, 32>}, {pipeline_mode = #tpu.pipeline_mode<synchronous>, transform_indices = @transform_5, window_bounds = array<i64: 4, 32, 32>}, {pipeline_mode = #tpu.pipeline_mode<synchronous>, transform_indices = @transform_6, window_bounds = array<i64: 4, 32>}, {pipeline_mode = #tpu.pipeline_mode<synchronous>, transform_indices = @transform_7, window_bounds = array<i64: 4, 32, 32>}, {pipeline_mode = #tpu.pipeline_mode<synchronous>, transform_indices = @transform_8, window_bounds = array<i64: 4, 32>}, {pipeline_mode = #tpu.pipeline_mode<synchronous>, transform_indices = @transform_9, window_bounds = array<i64: 4, 32, 32>}, {pipeline_mode = #tpu.pipeline_mode<synchronous>, transform_indices = @transform_10, window_bounds = array<i64: 4, 32>}, {pipeline_mode = #tpu.pipeline_mode<synchronous>, transform_indices = @transform_11, window_bounds = array<i64: 4, 32, 8>}, {pipeline_mode = #tpu.pipeline_mode<synchronous>, transform_indices = @transform_12, window_bounds = array<i64: 4, 8>}, {transform_indices = @transform_13, window_bounds = array<i64: 8, 8>}, {transform_indices = @transform_14, window_bounds = array<i64: 8, 4>}]} {
    %c0 = arith.constant 0 : index
    %c0_0 = arith.constant 0 : index
    %0 = vector.load %arg1[%c0, %c0_0] : memref<8x8xf32, #tpu.memory_space<vmem>>, vector<8x8xf32>
    %1 = vector.extract_strided_slice %0 {offsets = [0, 0], sizes = [8, 4], strides = [1, 1]} : vector<8x8xf32> to vector<8x4xf32>
    %2 = vector.extract_strided_slice %0 {offsets = [0, 4], sizes = [8, 4], strides = [1, 1]} : vector<8x8xf32> to vector<8x4xf32>
    %cst = arith.constant 0.000000e+00 : f32
    %3 = vector.broadcast %cst : f32 to vector<8x4xf32>
    %c0_i32 = arith.constant 0 : i32
    %4 = arith.index_cast %c0_i32 : i32 to index
    %c0_1 = arith.constant 0 : index
    %c0_2 = arith.constant 0 : index
    %5 = vector.load %arg2[%4, %c0_1, %c0_2] : memref<4x4x32xf32, #tpu.memory_space<vmem>>, vector<1x4x32xf32>
    %6 = vector.shape_cast %5 : vector<1x4x32xf32> to vector<4x32xf32>
    %cst_3 = arith.constant dense<0.000000e+00> : vector<8x32xf32>
    %7 = tpu.matmul %1, %6, %cst_3 {dimension_numbers = #tpu.dot_dimension_numbers<[1], [0], [0], [1], [0, 0, 1, 1], [], []>} : vector<8x4xf32>, vector<4x32xf32>, vector<8x32xf32> -> vector<8x32xf32>
    %8 = arith.index_cast %c0_i32 : i32 to index
    %c0_4 = arith.constant 0 : index
    %9 = vector.load %arg3[%8, %c0_4] : memref<4x32xf32, #tpu.memory_space<vmem>>, vector<1x32xf32>
    %10 = vector.shape_cast %9 : vector<1x32xf32> to vector<32xf32>
    %11 = vector.shape_cast %10 : vector<32xf32> to vector<1x32xf32>
    %12 = vector.broadcast %11 : vector<1x32xf32> to vector<8x32xf32>
    %13 = arith.addf %7, %12 : vector<8x32xf32>
    %cst_5 = arith.constant 0.000000e+00 : f32
    %14 = vector.broadcast %cst_5 : f32 to vector<8x32xf32>
    %15 = arith.maximumf %13, %14 : vector<8x32xf32>
    %16 = arith.index_cast %c0_i32 : i32 to index
    %c0_6 = arith.constant 0 : index
    %c0_7 = arith.constant 0 : index
    %17 = vector.load %arg4[%16, %c0_6, %c0_7] : memref<4x32x32xf32, #tpu.memory_space<vmem>>, vector<1x32x32xf32>
    %18 = vector.shape_cast %17 : vector<1x32x32xf32> to vector<32x32xf32>
    %cst_8 = arith.constant dense<0.000000e+00> : vector<8x32xf32>
    %19 = tpu.matmul %15, %18, %cst_8 {dimension_numbers = #tpu.dot_dimension_numbers<[1], [0], [0], [1], [0, 0, 1, 1], [], []>} : vector<8x32xf32>, vector<32x32xf32>, vector<8x32xf32> -> vector<8x32xf32>
    %20 = arith.index_cast %c0_i32 : i32 to index
    %c0_9 = arith.constant 0 : index
    %21 = vector.load %arg5[%20, %c0_9] : memref<4x32xf32, #tpu.memory_space<vmem>>, vector<1x32xf32>
    %22 = vector.shape_cast %21 : vector<1x32xf32> to vector<32xf32>
    %23 = vector.shape_cast %22 : vector<32xf32> to vector<1x32xf32>
    %24 = vector.broadcast %23 : vector<1x32xf32> to vector<8x32xf32>
    %25 = arith.addf %19, %24 : vector<8x32xf32>
    %cst_10 = arith.constant 0.000000e+00 : f32
    %26 = vector.broadcast %cst_10 : f32 to vector<8x32xf32>
    %27 = arith.maximumf %25, %26 : vector<8x32xf32>
    %28 = arith.index_cast %c0_i32 : i32 to index
    %c0_11 = arith.constant 0 : index
    %c0_12 = arith.constant 0 : index
    %29 = vector.load %arg6[%28, %c0_11, %c0_12] : memref<4x32x32xf32, #tpu.memory_space<vmem>>, vector<1x32x32xf32>
    %30 = vector.shape_cast %29 : vector<1x32x32xf32> to vector<32x32xf32>
    %cst_13 = arith.constant dense<0.000000e+00> : vector<8x32xf32>
    %31 = tpu.matmul %27, %30, %cst_13 {dimension_numbers = #tpu.dot_dimension_numbers<[1], [0], [0], [1], [0, 0, 1, 1], [], []>} : vector<8x32xf32>, vector<32x32xf32>, vector<8x32xf32> -> vector<8x32xf32>
    %32 = arith.index_cast %c0_i32 : i32 to index
    %c0_14 = arith.constant 0 : index
    %33 = vector.load %arg7[%32, %c0_14] : memref<4x32xf32, #tpu.memory_space<vmem>>, vector<1x32xf32>
    %34 = vector.shape_cast %33 : vector<1x32xf32> to vector<32xf32>
    %35 = vector.shape_cast %34 : vector<32xf32> to vector<1x32xf32>
    %36 = vector.broadcast %35 : vector<1x32xf32> to vector<8x32xf32>
    %37 = arith.addf %31, %36 : vector<8x32xf32>
    %cst_15 = arith.constant 0.000000e+00 : f32
    %38 = vector.broadcast %cst_15 : f32 to vector<8x32xf32>
    %39 = arith.maximumf %37, %38 : vector<8x32xf32>
    %40 = arith.index_cast %c0_i32 : i32 to index
    %c0_16 = arith.constant 0 : index
    %c0_17 = arith.constant 0 : index
    %41 = vector.load %arg8[%40, %c0_16, %c0_17] : memref<4x32x32xf32, #tpu.memory_space<vmem>>, vector<1x32x32xf32>
    %42 = vector.shape_cast %41 : vector<1x32x32xf32> to vector<32x32xf32>
    %cst_18 = arith.constant dense<0.000000e+00> : vector<8x32xf32>
    %43 = tpu.matmul %39, %42, %cst_18 {dimension_numbers = #tpu.dot_dimension_numbers<[1], [0], [0], [1], [0, 0, 1, 1], [], []>} : vector<8x32xf32>, vector<32x32xf32>, vector<8x32xf32> -> vector<8x32xf32>
    %44 = arith.index_cast %c0_i32 : i32 to index
    %c0_19 = arith.constant 0 : index
    %45 = vector.load %arg9[%44, %c0_19] : memref<4x32xf32, #tpu.memory_space<vmem>>, vector<1x32xf32>
    %46 = vector.shape_cast %45 : vector<1x32xf32> to vector<32xf32>
    %47 = vector.shape_cast %46 : vector<32xf32> to vector<1x32xf32>
    %48 = vector.broadcast %47 : vector<1x32xf32> to vector<8x32xf32>
    %49 = arith.addf %43, %48 : vector<8x32xf32>
    %cst_20 = arith.constant 0.000000e+00 : f32
    %50 = vector.broadcast %cst_20 : f32 to vector<8x32xf32>
    %51 = arith.maximumf %49, %50 : vector<8x32xf32>
    %52 = arith.index_cast %c0_i32 : i32 to index
    %c0_21 = arith.constant 0 : index
    %c0_22 = arith.constant 0 : index
    %53 = vector.load %arg10[%52, %c0_21, %c0_22] : memref<4x32x32xf32, #tpu.memory_space<vmem>>, vector<1x32x32xf32>
    %54 = vector.shape_cast %53 : vector<1x32x32xf32> to vector<32x32xf32>
    %cst_23 = arith.constant dense<0.000000e+00> : vector<8x32xf32>
    %55 = tpu.matmul %51, %54, %cst_23 {dimension_numbers = #tpu.dot_dimension_numbers<[1], [0], [0], [1], [0, 0, 1, 1], [], []>} : vector<8x32xf32>, vector<32x32xf32>, vector<8x32xf32> -> vector<8x32xf32>
    %56 = arith.index_cast %c0_i32 : i32 to index
    %c0_24 = arith.constant 0 : index
    %57 = vector.load %arg11[%56, %c0_24] : memref<4x32xf32, #tpu.memory_space<vmem>>, vector<1x32xf32>
    %58 = vector.shape_cast %57 : vector<1x32xf32> to vector<32xf32>
    %59 = vector.shape_cast %58 : vector<32xf32> to vector<1x32xf32>
    %60 = vector.broadcast %59 : vector<1x32xf32> to vector<8x32xf32>
    %61 = arith.addf %55, %60 : vector<8x32xf32>
    %cst_25 = arith.constant 0.000000e+00 : f32
    %62 = vector.broadcast %cst_25 : f32 to vector<8x32xf32>
    %63 = arith.maximumf %61, %62 : vector<8x32xf32>
    %64 = arith.index_cast %c0_i32 : i32 to index
    %c0_26 = arith.constant 0 : index
    %c0_27 = arith.constant 0 : index
    %65 = vector.load %arg12[%64, %c0_26, %c0_27] : memref<4x32x8xf32, #tpu.memory_space<vmem>>, vector<1x32x8xf32>
    %66 = vector.shape_cast %65 : vector<1x32x8xf32> to vector<32x8xf32>
    %cst_28 = arith.constant dense<0.000000e+00> : vector<8x8xf32>
    %67 = tpu.matmul %63, %66, %cst_28 {dimension_numbers = #tpu.dot_dimension_numbers<[1], [0], [0], [1], [0, 0, 1, 1], [], []>} : vector<8x32xf32>, vector<32x8xf32>, vector<8x8xf32> -> vector<8x8xf32>
    %68 = arith.index_cast %c0_i32 : i32 to index
    %c0_29 = arith.constant 0 : index
    %69 = vector.load %arg13[%68, %c0_29] : memref<4x8xf32, #tpu.memory_space<vmem>>, vector<1x8xf32>
    %70 = vector.shape_cast %69 : vector<1x8xf32> to vector<8xf32>
    %71 = vector.shape_cast %70 : vector<8xf32> to vector<1x8xf32>
    %72 = vector.broadcast %71 : vector<1x8xf32> to vector<8x8xf32>
    %73 = arith.addf %67, %72 : vector<8x8xf32>
    %74 = vector.extract_strided_slice %73 {offsets = [0, 0], sizes = [8, 4], strides = [1, 1]} : vector<8x8xf32> to vector<8x4xf32>
    %75 = math.tanh %74 : vector<8x4xf32>
    %76 = vector.extract_strided_slice %73 {offsets = [0, 4], sizes = [8, 4], strides = [1, 1]} : vector<8x8xf32> to vector<8x4xf32>
    %77 = math.exp %75 : vector<8x4xf32>
    %78 = arith.mulf %77, %2 : vector<8x4xf32>
    %79 = arith.addf %78, %76 : vector<8x4xf32>
    %80 = arith.addf %3, %75 : vector<8x4xf32>
    %c1_i32 = arith.constant 1 : i32
    %81 = arith.index_cast %c1_i32 : i32 to index
    %c0_30 = arith.constant 0 : index
    %c0_31 = arith.constant 0 : index
    %82 = vector.load %arg2[%81, %c0_30, %c0_31] : memref<4x4x32xf32, #tpu.memory_space<vmem>>, vector<1x4x32xf32>
    %83 = vector.shape_cast %82 : vector<1x4x32xf32> to vector<4x32xf32>
    %cst_32 = arith.constant dense<0.000000e+00> : vector<8x32xf32>
    %84 = tpu.matmul %79, %83, %cst_32 {dimension_numbers = #tpu.dot_dimension_numbers<[1], [0], [0], [1], [0, 0, 1, 1], [], []>} : vector<8x4xf32>, vector<4x32xf32>, vector<8x32xf32> -> vector<8x32xf32>
    %85 = arith.index_cast %c1_i32 : i32 to index
    %c0_33 = arith.constant 0 : index
    %86 = vector.load %arg3[%85, %c0_33] : memref<4x32xf32, #tpu.memory_space<vmem>>, vector<1x32xf32>
    %87 = vector.shape_cast %86 : vector<1x32xf32> to vector<32xf32>
    %88 = vector.shape_cast %87 : vector<32xf32> to vector<1x32xf32>
    %89 = vector.broadcast %88 : vector<1x32xf32> to vector<8x32xf32>
    %90 = arith.addf %84, %89 : vector<8x32xf32>
    %cst_34 = arith.constant 0.000000e+00 : f32
    %91 = vector.broadcast %cst_34 : f32 to vector<8x32xf32>
    %92 = arith.maximumf %90, %91 : vector<8x32xf32>
    %93 = arith.index_cast %c1_i32 : i32 to index
    %c0_35 = arith.constant 0 : index
    %c0_36 = arith.constant 0 : index
    %94 = vector.load %arg4[%93, %c0_35, %c0_36] : memref<4x32x32xf32, #tpu.memory_space<vmem>>, vector<1x32x32xf32>
    %95 = vector.shape_cast %94 : vector<1x32x32xf32> to vector<32x32xf32>
    %cst_37 = arith.constant dense<0.000000e+00> : vector<8x32xf32>
    %96 = tpu.matmul %92, %95, %cst_37 {dimension_numbers = #tpu.dot_dimension_numbers<[1], [0], [0], [1], [0, 0, 1, 1], [], []>} : vector<8x32xf32>, vector<32x32xf32>, vector<8x32xf32> -> vector<8x32xf32>
    %97 = arith.index_cast %c1_i32 : i32 to index
    %c0_38 = arith.constant 0 : index
    %98 = vector.load %arg5[%97, %c0_38] : memref<4x32xf32, #tpu.memory_space<vmem>>, vector<1x32xf32>
    %99 = vector.shape_cast %98 : vector<1x32xf32> to vector<32xf32>
    %100 = vector.shape_cast %99 : vector<32xf32> to vector<1x32xf32>
    %101 = vector.broadcast %100 : vector<1x32xf32> to vector<8x32xf32>
    %102 = arith.addf %96, %101 : vector<8x32xf32>
    %cst_39 = arith.constant 0.000000e+00 : f32
    %103 = vector.broadcast %cst_39 : f32 to vector<8x32xf32>
    %104 = arith.maximumf %102, %103 : vector<8x32xf32>
    %105 = arith.index_cast %c1_i32 : i32 to index
    %c0_40 = arith.constant 0 : index
    %c0_41 = arith.constant 0 : index
    %106 = vector.load %arg6[%105, %c0_40, %c0_41] : memref<4x32x32xf32, #tpu.memory_space<vmem>>, vector<1x32x32xf32>
    %107 = vector.shape_cast %106 : vector<1x32x32xf32> to vector<32x32xf32>
    %cst_42 = arith.constant dense<0.000000e+00> : vector<8x32xf32>
    %108 = tpu.matmul %104, %107, %cst_42 {dimension_numbers = #tpu.dot_dimension_numbers<[1], [0], [0], [1], [0, 0, 1, 1], [], []>} : vector<8x32xf32>, vector<32x32xf32>, vector<8x32xf32> -> vector<8x32xf32>
    %109 = arith.index_cast %c1_i32 : i32 to index
    %c0_43 = arith.constant 0 : index
    %110 = vector.load %arg7[%109, %c0_43] : memref<4x32xf32, #tpu.memory_space<vmem>>, vector<1x32xf32>
    %111 = vector.shape_cast %110 : vector<1x32xf32> to vector<32xf32>
    %112 = vector.shape_cast %111 : vector<32xf32> to vector<1x32xf32>
    %113 = vector.broadcast %112 : vector<1x32xf32> to vector<8x32xf32>
    %114 = arith.addf %108, %113 : vector<8x32xf32>
    %cst_44 = arith.constant 0.000000e+00 : f32
    %115 = vector.broadcast %cst_44 : f32 to vector<8x32xf32>
    %116 = arith.maximumf %114, %115 : vector<8x32xf32>
    %117 = arith.index_cast %c1_i32 : i32 to index
    %c0_45 = arith.constant 0 : index
    %c0_46 = arith.constant 0 : index
    %118 = vector.load %arg8[%117, %c0_45, %c0_46] : memref<4x32x32xf32, #tpu.memory_space<vmem>>, vector<1x32x32xf32>
    %119 = vector.shape_cast %118 : vector<1x32x32xf32> to vector<32x32xf32>
    %cst_47 = arith.constant dense<0.000000e+00> : vector<8x32xf32>
    %120 = tpu.matmul %116, %119, %cst_47 {dimension_numbers = #tpu.dot_dimension_numbers<[1], [0], [0], [1], [0, 0, 1, 1], [], []>} : vector<8x32xf32>, vector<32x32xf32>, vector<8x32xf32> -> vector<8x32xf32>
    %121 = arith.index_cast %c1_i32 : i32 to index
    %c0_48 = arith.constant 0 : index
    %122 = vector.load %arg9[%121, %c0_48] : memref<4x32xf32, #tpu.memory_space<vmem>>, vector<1x32xf32>
    %123 = vector.shape_cast %122 : vector<1x32xf32> to vector<32xf32>
    %124 = vector.shape_cast %123 : vector<32xf32> to vector<1x32xf32>
    %125 = vector.broadcast %124 : vector<1x32xf32> to vector<8x32xf32>
    %126 = arith.addf %120, %125 : vector<8x32xf32>
    %cst_49 = arith.constant 0.000000e+00 : f32
    %127 = vector.broadcast %cst_49 : f32 to vector<8x32xf32>
    %128 = arith.maximumf %126, %127 : vector<8x32xf32>
    %129 = arith.index_cast %c1_i32 : i32 to index
    %c0_50 = arith.constant 0 : index
    %c0_51 = arith.constant 0 : index
    %130 = vector.load %arg10[%129, %c0_50, %c0_51] : memref<4x32x32xf32, #tpu.memory_space<vmem>>, vector<1x32x32xf32>
    %131 = vector.shape_cast %130 : vector<1x32x32xf32> to vector<32x32xf32>
    %cst_52 = arith.constant dense<0.000000e+00> : vector<8x32xf32>
    %132 = tpu.matmul %128, %131, %cst_52 {dimension_numbers = #tpu.dot_dimension_numbers<[1], [0], [0], [1], [0, 0, 1, 1], [], []>} : vector<8x32xf32>, vector<32x32xf32>, vector<8x32xf32> -> vector<8x32xf32>
    %133 = arith.index_cast %c1_i32 : i32 to index
    %c0_53 = arith.constant 0 : index
    %134 = vector.load %arg11[%133, %c0_53] : memref<4x32xf32, #tpu.memory_space<vmem>>, vector<1x32xf32>
    %135 = vector.shape_cast %134 : vector<1x32xf32> to vector<32xf32>
    %136 = vector.shape_cast %135 : vector<32xf32> to vector<1x32xf32>
    %137 = vector.broadcast %136 : vector<1x32xf32> to vector<8x32xf32>
    %138 = arith.addf %132, %137 : vector<8x32xf32>
    %cst_54 = arith.constant 0.000000e+00 : f32
    %139 = vector.broadcast %cst_54 : f32 to vector<8x32xf32>
    %140 = arith.maximumf %138, %139 : vector<8x32xf32>
    %141 = arith.index_cast %c1_i32 : i32 to index
    %c0_55 = arith.constant 0 : index
    %c0_56 = arith.constant 0 : index
    %142 = vector.load %arg12[%141, %c0_55, %c0_56] : memref<4x32x8xf32, #tpu.memory_space<vmem>>, vector<1x32x8xf32>
    %143 = vector.shape_cast %142 : vector<1x32x8xf32> to vector<32x8xf32>
    %cst_57 = arith.constant dense<0.000000e+00> : vector<8x8xf32>
    %144 = tpu.matmul %140, %143, %cst_57 {dimension_numbers = #tpu.dot_dimension_numbers<[1], [0], [0], [1], [0, 0, 1, 1], [], []>} : vector<8x32xf32>, vector<32x8xf32>, vector<8x8xf32> -> vector<8x8xf32>
    %145 = arith.index_cast %c1_i32 : i32 to index
    %c0_58 = arith.constant 0 : index
    %146 = vector.load %arg13[%145, %c0_58] : memref<4x8xf32, #tpu.memory_space<vmem>>, vector<1x8xf32>
    %147 = vector.shape_cast %146 : vector<1x8xf32> to vector<8xf32>
    %148 = vector.shape_cast %147 : vector<8xf32> to vector<1x8xf32>
    %149 = vector.broadcast %148 : vector<1x8xf32> to vector<8x8xf32>
    %150 = arith.addf %144, %149 : vector<8x8xf32>
    %151 = vector.extract_strided_slice %150 {offsets = [0, 0], sizes = [8, 4], strides = [1, 1]} : vector<8x8xf32> to vector<8x4xf32>
    %152 = math.tanh %151 : vector<8x4xf32>
    %153 = vector.extract_strided_slice %150 {offsets = [0, 4], sizes = [8, 4], strides = [1, 1]} : vector<8x8xf32> to vector<8x4xf32>
    %154 = math.exp %152 : vector<8x4xf32>
    %155 = arith.mulf %154, %1 : vector<8x4xf32>
    %156 = arith.addf %155, %153 : vector<8x4xf32>
    %157 = arith.addf %80, %152 : vector<8x4xf32>
    %c2_i32 = arith.constant 2 : i32
    %158 = arith.index_cast %c2_i32 : i32 to index
    %c0_59 = arith.constant 0 : index
    %c0_60 = arith.constant 0 : index
    %159 = vector.load %arg2[%158, %c0_59, %c0_60] : memref<4x4x32xf32, #tpu.memory_space<vmem>>, vector<1x4x32xf32>
    %160 = vector.shape_cast %159 : vector<1x4x32xf32> to vector<4x32xf32>
    %cst_61 = arith.constant dense<0.000000e+00> : vector<8x32xf32>
    %161 = tpu.matmul %156, %160, %cst_61 {dimension_numbers = #tpu.dot_dimension_numbers<[1], [0], [0], [1], [0, 0, 1, 1], [], []>} : vector<8x4xf32>, vector<4x32xf32>, vector<8x32xf32> -> vector<8x32xf32>
    %162 = arith.index_cast %c2_i32 : i32 to index
    %c0_62 = arith.constant 0 : index
    %163 = vector.load %arg3[%162, %c0_62] : memref<4x32xf32, #tpu.memory_space<vmem>>, vector<1x32xf32>
    %164 = vector.shape_cast %163 : vector<1x32xf32> to vector<32xf32>
    %165 = vector.shape_cast %164 : vector<32xf32> to vector<1x32xf32>
    %166 = vector.broadcast %165 : vector<1x32xf32> to vector<8x32xf32>
    %167 = arith.addf %161, %166 : vector<8x32xf32>
    %cst_63 = arith.constant 0.000000e+00 : f32
    %168 = vector.broadcast %cst_63 : f32 to vector<8x32xf32>
    %169 = arith.maximumf %167, %168 : vector<8x32xf32>
    %170 = arith.index_cast %c2_i32 : i32 to index
    %c0_64 = arith.constant 0 : index
    %c0_65 = arith.constant 0 : index
    %171 = vector.load %arg4[%170, %c0_64, %c0_65] : memref<4x32x32xf32, #tpu.memory_space<vmem>>, vector<1x32x32xf32>
    %172 = vector.shape_cast %171 : vector<1x32x32xf32> to vector<32x32xf32>
    %cst_66 = arith.constant dense<0.000000e+00> : vector<8x32xf32>
    %173 = tpu.matmul %169, %172, %cst_66 {dimension_numbers = #tpu.dot_dimension_numbers<[1], [0], [0], [1], [0, 0, 1, 1], [], []>} : vector<8x32xf32>, vector<32x32xf32>, vector<8x32xf32> -> vector<8x32xf32>
    %174 = arith.index_cast %c2_i32 : i32 to index
    %c0_67 = arith.constant 0 : index
    %175 = vector.load %arg5[%174, %c0_67] : memref<4x32xf32, #tpu.memory_space<vmem>>, vector<1x32xf32>
    %176 = vector.shape_cast %175 : vector<1x32xf32> to vector<32xf32>
    %177 = vector.shape_cast %176 : vector<32xf32> to vector<1x32xf32>
    %178 = vector.broadcast %177 : vector<1x32xf32> to vector<8x32xf32>
    %179 = arith.addf %173, %178 : vector<8x32xf32>
    %cst_68 = arith.constant 0.000000e+00 : f32
    %180 = vector.broadcast %cst_68 : f32 to vector<8x32xf32>
    %181 = arith.maximumf %179, %180 : vector<8x32xf32>
    %182 = arith.index_cast %c2_i32 : i32 to index
    %c0_69 = arith.constant 0 : index
    %c0_70 = arith.constant 0 : index
    %183 = vector.load %arg6[%182, %c0_69, %c0_70] : memref<4x32x32xf32, #tpu.memory_space<vmem>>, vector<1x32x32xf32>
    %184 = vector.shape_cast %183 : vector<1x32x32xf32> to vector<32x32xf32>
    %cst_71 = arith.constant dense<0.000000e+00> : vector<8x32xf32>
    %185 = tpu.matmul %181, %184, %cst_71 {dimension_numbers = #tpu.dot_dimension_numbers<[1], [0], [0], [1], [0, 0, 1, 1], [], []>} : vector<8x32xf32>, vector<32x32xf32>, vector<8x32xf32> -> vector<8x32xf32>
    %186 = arith.index_cast %c2_i32 : i32 to index
    %c0_72 = arith.constant 0 : index
    %187 = vector.load %arg7[%186, %c0_72] : memref<4x32xf32, #tpu.memory_space<vmem>>, vector<1x32xf32>
    %188 = vector.shape_cast %187 : vector<1x32xf32> to vector<32xf32>
    %189 = vector.shape_cast %188 : vector<32xf32> to vector<1x32xf32>
    %190 = vector.broadcast %189 : vector<1x32xf32> to vector<8x32xf32>
    %191 = arith.addf %185, %190 : vector<8x32xf32>
    %cst_73 = arith.constant 0.000000e+00 : f32
    %192 = vector.broadcast %cst_73 : f32 to vector<8x32xf32>
    %193 = arith.maximumf %191, %192 : vector<8x32xf32>
    %194 = arith.index_cast %c2_i32 : i32 to index
    %c0_74 = arith.constant 0 : index
    %c0_75 = arith.constant 0 : index
    %195 = vector.load %arg8[%194, %c0_74, %c0_75] : memref<4x32x32xf32, #tpu.memory_space<vmem>>, vector<1x32x32xf32>
    %196 = vector.shape_cast %195 : vector<1x32x32xf32> to vector<32x32xf32>
    %cst_76 = arith.constant dense<0.000000e+00> : vector<8x32xf32>
    %197 = tpu.matmul %193, %196, %cst_76 {dimension_numbers = #tpu.dot_dimension_numbers<[1], [0], [0], [1], [0, 0, 1, 1], [], []>} : vector<8x32xf32>, vector<32x32xf32>, vector<8x32xf32> -> vector<8x32xf32>
    %198 = arith.index_cast %c2_i32 : i32 to index
    %c0_77 = arith.constant 0 : index
    %199 = vector.load %arg9[%198, %c0_77] : memref<4x32xf32, #tpu.memory_space<vmem>>, vector<1x32xf32>
    %200 = vector.shape_cast %199 : vector<1x32xf32> to vector<32xf32>
    %201 = vector.shape_cast %200 : vector<32xf32> to vector<1x32xf32>
    %202 = vector.broadcast %201 : vector<1x32xf32> to vector<8x32xf32>
    %203 = arith.addf %197, %202 : vector<8x32xf32>
    %cst_78 = arith.constant 0.000000e+00 : f32
    %204 = vector.broadcast %cst_78 : f32 to vector<8x32xf32>
    %205 = arith.maximumf %203, %204 : vector<8x32xf32>
    %206 = arith.index_cast %c2_i32 : i32 to index
    %c0_79 = arith.constant 0 : index
    %c0_80 = arith.constant 0 : index
    %207 = vector.load %arg10[%206, %c0_79, %c0_80] : memref<4x32x32xf32, #tpu.memory_space<vmem>>, vector<1x32x32xf32>
    %208 = vector.shape_cast %207 : vector<1x32x32xf32> to vector<32x32xf32>
    %cst_81 = arith.constant dense<0.000000e+00> : vector<8x32xf32>
    %209 = tpu.matmul %205, %208, %cst_81 {dimension_numbers = #tpu.dot_dimension_numbers<[1], [0], [0], [1], [0, 0, 1, 1], [], []>} : vector<8x32xf32>, vector<32x32xf32>, vector<8x32xf32> -> vector<8x32xf32>
    %210 = arith.index_cast %c2_i32 : i32 to index
    %c0_82 = arith.constant 0 : index
    %211 = vector.load %arg11[%210, %c0_82] : memref<4x32xf32, #tpu.memory_space<vmem>>, vector<1x32xf32>
    %212 = vector.shape_cast %211 : vector<1x32xf32> to vector<32xf32>
    %213 = vector.shape_cast %212 : vector<32xf32> to vector<1x32xf32>
    %214 = vector.broadcast %213 : vector<1x32xf32> to vector<8x32xf32>
    %215 = arith.addf %209, %214 : vector<8x32xf32>
    %cst_83 = arith.constant 0.000000e+00 : f32
    %216 = vector.broadcast %cst_83 : f32 to vector<8x32xf32>
    %217 = arith.maximumf %215, %216 : vector<8x32xf32>
    %218 = arith.index_cast %c2_i32 : i32 to index
    %c0_84 = arith.constant 0 : index
    %c0_85 = arith.constant 0 : index
    %219 = vector.load %arg12[%218, %c0_84, %c0_85] : memref<4x32x8xf32, #tpu.memory_space<vmem>>, vector<1x32x8xf32>
    %220 = vector.shape_cast %219 : vector<1x32x8xf32> to vector<32x8xf32>
    %cst_86 = arith.constant dense<0.000000e+00> : vector<8x8xf32>
    %221 = tpu.matmul %217, %220, %cst_86 {dimension_numbers = #tpu.dot_dimension_numbers<[1], [0], [0], [1], [0, 0, 1, 1], [], []>} : vector<8x32xf32>, vector<32x8xf32>, vector<8x8xf32> -> vector<8x8xf32>
    %222 = arith.index_cast %c2_i32 : i32 to index
    %c0_87 = arith.constant 0 : index
    %223 = vector.load %arg13[%222, %c0_87] : memref<4x8xf32, #tpu.memory_space<vmem>>, vector<1x8xf32>
    %224 = vector.shape_cast %223 : vector<1x8xf32> to vector<8xf32>
    %225 = vector.shape_cast %224 : vector<8xf32> to vector<1x8xf32>
    %226 = vector.broadcast %225 : vector<1x8xf32> to vector<8x8xf32>
    %227 = arith.addf %221, %226 : vector<8x8xf32>
    %228 = vector.extract_strided_slice %227 {offsets = [0, 0], sizes = [8, 4], strides = [1, 1]} : vector<8x8xf32> to vector<8x4xf32>
    %229 = math.tanh %228 : vector<8x4xf32>
    %230 = vector.extract_strided_slice %227 {offsets = [0, 4], sizes = [8, 4], strides = [1, 1]} : vector<8x8xf32> to vector<8x4xf32>
    %231 = math.exp %229 : vector<8x4xf32>
    %232 = arith.mulf %231, %79 : vector<8x4xf32>
    %233 = arith.addf %232, %230 : vector<8x4xf32>
    %234 = arith.addf %157, %229 : vector<8x4xf32>
    %c3_i32 = arith.constant 3 : i32
    %235 = arith.index_cast %c3_i32 : i32 to index
    %c0_88 = arith.constant 0 : index
    %c0_89 = arith.constant 0 : index
    %236 = vector.load %arg2[%235, %c0_88, %c0_89] : memref<4x4x32xf32, #tpu.memory_space<vmem>>, vector<1x4x32xf32>
    %237 = vector.shape_cast %236 : vector<1x4x32xf32> to vector<4x32xf32>
    %cst_90 = arith.constant dense<0.000000e+00> : vector<8x32xf32>
    %238 = tpu.matmul %233, %237, %cst_90 {dimension_numbers = #tpu.dot_dimension_numbers<[1], [0], [0], [1], [0, 0, 1, 1], [], []>} : vector<8x4xf32>, vector<4x32xf32>, vector<8x32xf32> -> vector<8x32xf32>
    %239 = arith.index_cast %c3_i32 : i32 to index
    %c0_91 = arith.constant 0 : index
    %240 = vector.load %arg3[%239, %c0_91] : memref<4x32xf32, #tpu.memory_space<vmem>>, vector<1x32xf32>
    %241 = vector.shape_cast %240 : vector<1x32xf32> to vector<32xf32>
    %242 = vector.shape_cast %241 : vector<32xf32> to vector<1x32xf32>
    %243 = vector.broadcast %242 : vector<1x32xf32> to vector<8x32xf32>
    %244 = arith.addf %238, %243 : vector<8x32xf32>
    %cst_92 = arith.constant 0.000000e+00 : f32
    %245 = vector.broadcast %cst_92 : f32 to vector<8x32xf32>
    %246 = arith.maximumf %244, %245 : vector<8x32xf32>
    %247 = arith.index_cast %c3_i32 : i32 to index
    %c0_93 = arith.constant 0 : index
    %c0_94 = arith.constant 0 : index
    %248 = vector.load %arg4[%247, %c0_93, %c0_94] : memref<4x32x32xf32, #tpu.memory_space<vmem>>, vector<1x32x32xf32>
    %249 = vector.shape_cast %248 : vector<1x32x32xf32> to vector<32x32xf32>
    %cst_95 = arith.constant dense<0.000000e+00> : vector<8x32xf32>
    %250 = tpu.matmul %246, %249, %cst_95 {dimension_numbers = #tpu.dot_dimension_numbers<[1], [0], [0], [1], [0, 0, 1, 1], [], []>} : vector<8x32xf32>, vector<32x32xf32>, vector<8x32xf32> -> vector<8x32xf32>
    %251 = arith.index_cast %c3_i32 : i32 to index
    %c0_96 = arith.constant 0 : index
    %252 = vector.load %arg5[%251, %c0_96] : memref<4x32xf32, #tpu.memory_space<vmem>>, vector<1x32xf32>
    %253 = vector.shape_cast %252 : vector<1x32xf32> to vector<32xf32>
    %254 = vector.shape_cast %253 : vector<32xf32> to vector<1x32xf32>
    %255 = vector.broadcast %254 : vector<1x32xf32> to vector<8x32xf32>
    %256 = arith.addf %250, %255 : vector<8x32xf32>
    %cst_97 = arith.constant 0.000000e+00 : f32
    %257 = vector.broadcast %cst_97 : f32 to vector<8x32xf32>
    %258 = arith.maximumf %256, %257 : vector<8x32xf32>
    %259 = arith.index_cast %c3_i32 : i32 to index
    %c0_98 = arith.constant 0 : index
    %c0_99 = arith.constant 0 : index
    %260 = vector.load %arg6[%259, %c0_98, %c0_99] : memref<4x32x32xf32, #tpu.memory_space<vmem>>, vector<1x32x32xf32>
    %261 = vector.shape_cast %260 : vector<1x32x32xf32> to vector<32x32xf32>
    %cst_100 = arith.constant dense<0.000000e+00> : vector<8x32xf32>
    %262 = tpu.matmul %258, %261, %cst_100 {dimension_numbers = #tpu.dot_dimension_numbers<[1], [0], [0], [1], [0, 0, 1, 1], [], []>} : vector<8x32xf32>, vector<32x32xf32>, vector<8x32xf32> -> vector<8x32xf32>
    %263 = arith.index_cast %c3_i32 : i32 to index
    %c0_101 = arith.constant 0 : index
    %264 = vector.load %arg7[%263, %c0_101] : memref<4x32xf32, #tpu.memory_space<vmem>>, vector<1x32xf32>
    %265 = vector.shape_cast %264 : vector<1x32xf32> to vector<32xf32>
    %266 = vector.shape_cast %265 : vector<32xf32> to vector<1x32xf32>
    %267 = vector.broadcast %266 : vector<1x32xf32> to vector<8x32xf32>
    %268 = arith.addf %262, %267 : vector<8x32xf32>
    %cst_102 = arith.constant 0.000000e+00 : f32
    %269 = vector.broadcast %cst_102 : f32 to vector<8x32xf32>
    %270 = arith.maximumf %268, %269 : vector<8x32xf32>
    %271 = arith.index_cast %c3_i32 : i32 to index
    %c0_103 = arith.constant 0 : index
    %c0_104 = arith.constant 0 : index
    %272 = vector.load %arg8[%271, %c0_103, %c0_104] : memref<4x32x32xf32, #tpu.memory_space<vmem>>, vector<1x32x32xf32>
    %273 = vector.shape_cast %272 : vector<1x32x32xf32> to vector<32x32xf32>
    %cst_105 = arith.constant dense<0.000000e+00> : vector<8x32xf32>
    %274 = tpu.matmul %270, %273, %cst_105 {dimension_numbers = #tpu.dot_dimension_numbers<[1], [0], [0], [1], [0, 0, 1, 1], [], []>} : vector<8x32xf32>, vector<32x32xf32>, vector<8x32xf32> -> vector<8x32xf32>
    %275 = arith.index_cast %c3_i32 : i32 to index
    %c0_106 = arith.constant 0 : index
    %276 = vector.load %arg9[%275, %c0_106] : memref<4x32xf32, #tpu.memory_space<vmem>>, vector<1x32xf32>
    %277 = vector.shape_cast %276 : vector<1x32xf32> to vector<32xf32>
    %278 = vector.shape_cast %277 : vector<32xf32> to vector<1x32xf32>
    %279 = vector.broadcast %278 : vector<1x32xf32> to vector<8x32xf32>
    %280 = arith.addf %274, %279 : vector<8x32xf32>
    %cst_107 = arith.constant 0.000000e+00 : f32
    %281 = vector.broadcast %cst_107 : f32 to vector<8x32xf32>
    %282 = arith.maximumf %280, %281 : vector<8x32xf32>
    %283 = arith.index_cast %c3_i32 : i32 to index
    %c0_108 = arith.constant 0 : index
    %c0_109 = arith.constant 0 : index
    %284 = vector.load %arg10[%283, %c0_108, %c0_109] : memref<4x32x32xf32, #tpu.memory_space<vmem>>, vector<1x32x32xf32>
    %285 = vector.shape_cast %284 : vector<1x32x32xf32> to vector<32x32xf32>
    %cst_110 = arith.constant dense<0.000000e+00> : vector<8x32xf32>
    %286 = tpu.matmul %282, %285, %cst_110 {dimension_numbers = #tpu.dot_dimension_numbers<[1], [0], [0], [1], [0, 0, 1, 1], [], []>} : vector<8x32xf32>, vector<32x32xf32>, vector<8x32xf32> -> vector<8x32xf32>
    %287 = arith.index_cast %c3_i32 : i32 to index
    %c0_111 = arith.constant 0 : index
    %288 = vector.load %arg11[%287, %c0_111] : memref<4x32xf32, #tpu.memory_space<vmem>>, vector<1x32xf32>
    %289 = vector.shape_cast %288 : vector<1x32xf32> to vector<32xf32>
    %290 = vector.shape_cast %289 : vector<32xf32> to vector<1x32xf32>
    %291 = vector.broadcast %290 : vector<1x32xf32> to vector<8x32xf32>
    %292 = arith.addf %286, %291 : vector<8x32xf32>
    %cst_112 = arith.constant 0.000000e+00 : f32
    %293 = vector.broadcast %cst_112 : f32 to vector<8x32xf32>
    %294 = arith.maximumf %292, %293 : vector<8x32xf32>
    %295 = arith.index_cast %c3_i32 : i32 to index
    %c0_113 = arith.constant 0 : index
    %c0_114 = arith.constant 0 : index
    %296 = vector.load %arg12[%295, %c0_113, %c0_114] : memref<4x32x8xf32, #tpu.memory_space<vmem>>, vector<1x32x8xf32>
    %297 = vector.shape_cast %296 : vector<1x32x8xf32> to vector<32x8xf32>
    %cst_115 = arith.constant dense<0.000000e+00> : vector<8x8xf32>
    %298 = tpu.matmul %294, %297, %cst_115 {dimension_numbers = #tpu.dot_dimension_numbers<[1], [0], [0], [1], [0, 0, 1, 1], [], []>} : vector<8x32xf32>, vector<32x8xf32>, vector<8x8xf32> -> vector<8x8xf32>
    %299 = arith.index_cast %c3_i32 : i32 to index
    %c0_116 = arith.constant 0 : index
    %300 = vector.load %arg13[%299, %c0_116] : memref<4x8xf32, #tpu.memory_space<vmem>>, vector<1x8xf32>
    %301 = vector.shape_cast %300 : vector<1x8xf32> to vector<8xf32>
    %302 = vector.shape_cast %301 : vector<8xf32> to vector<1x8xf32>
    %303 = vector.broadcast %302 : vector<1x8xf32> to vector<8x8xf32>
    %304 = arith.addf %298, %303 : vector<8x8xf32>
    %305 = vector.extract_strided_slice %304 {offsets = [0, 0], sizes = [8, 4], strides = [1, 1]} : vector<8x8xf32> to vector<8x4xf32>
    %306 = math.tanh %305 : vector<8x4xf32>
    %307 = vector.extract_strided_slice %304 {offsets = [0, 4], sizes = [8, 4], strides = [1, 1]} : vector<8x8xf32> to vector<8x4xf32>
    %308 = math.exp %306 : vector<8x4xf32>
    %309 = arith.mulf %308, %156 : vector<8x4xf32>
    %310 = arith.addf %309, %307 : vector<8x4xf32>
    %311 = arith.addf %234, %306 : vector<8x4xf32>
    %c4_i32 = arith.constant 4 : i32
    %312 = tpu.concatenate %310, %233 in 1 : vector<8x4xf32>, vector<8x4xf32> -> vector<8x8xf32>
    %c0_117 = arith.constant 0 : index
    %c0_118 = arith.constant 0 : index
    %313 = vector.load %arg14[%c0_117, %c0_118] : memref<8x8xf32, #tpu.memory_space<vmem>>, vector<8x8xf32>
    tpu.vector_store %arg14[%c0_117, %c0_118], %312 {strides = array<i32>} : memref<8x8xf32, #tpu.memory_space<vmem>>, vector<8x8xf32>,
    %c0_119 = arith.constant 0 : index
    %c0_120 = arith.constant 0 : index
    %314 = vector.load %arg15[%c0_119, %c0_120] : memref<8x4xf32, #tpu.memory_space<vmem>>, vector<8x4xf32>
    tpu.vector_store %arg15[%c0_119, %c0_120], %311 {strides = array<i32>} : memref<8x4xf32, #tpu.memory_space<vmem>>, vector<8x4xf32>,
    return
  }
  func.func @transform_0(%arg0: i32) -> (i32, i32) {
    %c0_i32 = arith.constant 0 : i32
    %c0_i32_0 = arith.constant 0 : i32
    return %arg0, %c0_i32 : i32, i32
  }
  func.func @transform_1(%arg0: i32) -> (i32, i32, i32) {
    %c0_i32 = arith.constant 0 : i32
    %c0_i32_0 = arith.constant 0 : i32
    %c0_i32_1 = arith.constant 0 : i32
    %c0_i32_2 = arith.constant 0 : i32
    return %c0_i32, %c0_i32_0, %c0_i32_1 : i32, i32, i32
  }
  func.func @transform_2(%arg0: i32) -> (i32, i32) {
    %c0_i32 = arith.constant 0 : i32
    %c0_i32_0 = arith.constant 0 : i32
    %c0_i32_1 = arith.constant 0 : i32
    return %c0_i32, %c0_i32_0 : i32, i32
  }
  func.func @transform_3(%arg0: i32) -> (i32, i32, i32) {
    %c0_i32 = arith.constant 0 : i32
    %c0_i32_0 = arith.constant 0 : i32
    %c0_i32_1 = arith.constant 0 : i32
    %c0_i32_2 = arith.constant 0 : i32
    return %c0_i32, %c0_i32_0, %c0_i32_1 : i32, i32, i32
  }
  func.func @transform_4(%arg0: i32) -> (i32, i32) {
    %c0_i32 = arith.constant 0 : i32
    %c0_i32_0 = arith.constant 0 : i32
    %c0_i32_1 = arith.constant 0 : i32
    return %c0_i32, %c0_i32_0 : i32, i32
  }
  func.func @transform_5(%arg0: i32) -> (i32, i32, i32) {
    %c0_i32 = arith.constant 0 : i32
    %c0_i32_0 = arith.constant 0 : i32
    %c0_i32_1 = arith.constant 0 : i32
    %c0_i32_2 = arith.constant 0 : i32
    return %c0_i32, %c0_i32_0, %c0_i32_1 : i32, i32, i32
  }
  func.func @transform_6(%arg0: i32) -> (i32, i32) {
    %c0_i32 = arith.constant 0 : i32
    %c0_i32_0 = arith.constant 0 : i32
    %c0_i32_1 = arith.constant 0 : i32
    return %c0_i32, %c0_i32_0 : i32, i32
  }
  func.func @transform_7(%arg0: i32) -> (i32, i32, i32) {
    %c0_i32 = arith.constant 0 : i32
    %c0_i32_0 = arith.constant 0 : i32
    %c0_i32_1 = arith.constant 0 : i32
    %c0_i32_2 = arith.constant 0 : i32
    return %c0_i32, %c0_i32_0, %c0_i32_1 : i32, i32, i32
  }
  func.func @transform_8(%arg0: i32) -> (i32, i32) {
    %c0_i32 = arith.constant 0 : i32
    %c0_i32_0 = arith.constant 0 : i32
    %c0_i32_1 = arith.constant 0 : i32
    return %c0_i32, %c0_i32_0 : i32, i32
  }
  func.func @transform_9(%arg0: i32) -> (i32, i32, i32) {
    %c0_i32 = arith.constant 0 : i32
    %c0_i32_0 = arith.constant 0 : i32
    %c0_i32_1 = arith.constant 0 : i32
    %c0_i32_2 = arith.constant 0 : i32
    return %c0_i32, %c0_i32_0, %c0_i32_1 : i32, i32, i32
  }
  func.func @transform_10(%arg0: i32) -> (i32, i32) {
    %c0_i32 = arith.constant 0 : i32
    %c0_i32_0 = arith.constant 0 : i32
    %c0_i32_1 = arith.constant 0 : i32
    return %c0_i32, %c0_i32_0 : i32, i32
  }
  func.func @transform_11(%arg0: i32) -> (i32, i32, i32) {
    %c0_i32 = arith.constant 0 : i32
    %c0_i32_0 = arith.constant 0 : i32
    %c0_i32_1 = arith.constant 0 : i32
    %c0_i32_2 = arith.constant 0 : i32
    return %c0_i32, %c0_i32_0, %c0_i32_1 : i32, i32, i32
  }
  func.func @transform_12(%arg0: i32) -> (i32, i32) {
    %c0_i32 = arith.constant 0 : i32
    %c0_i32_0 = arith.constant 0 : i32
    %c0_i32_1 = arith.constant 0 : i32
    return %c0_i32, %c0_i32_0 : i32, i32
  }
  func.func @transform_13(%arg0: i32) -> (i32, i32) {
    %c0_i32 = arith.constant 0 : i32
    %c0_i32_0 = arith.constant 0 : i32
    return %arg0, %c0_i32 : i32, i32
  }
  func.func @transform_14(%arg0: i32) -> (i32, i32) {
    %c0_i32 = arith.constant 0 : i32
    %c0_i32_0 = arith.constant 0 : i32
    return %arg0, %c0_i32 : i32, i32
  }
}

</mosaic_0001>

<bundles_post_ra>
// kernel: tpu_custom_call.1
= control target key start
LH: loop header
LB: loop body
LE: loop exit
PB: predicated region body
PF: predicated region fallthrough
CT: control target
= control target key end

     0   :  { %20 = vsyncpa [#allocation3], 0  ;;  %s1517_s0 = inlined_call_operand.vmem [shape: f32[8,8], index: 0, kind: input, shape index: {}]   ;;  %s1518_s1 = inlined_call_operand.vmem [shape: f32[4,4,32], index: 1, kind: input, shape index: {}]   ;;  %s1519_s2 = inlined_call_operand.vmem [shape: f32[4,32], index: 2, kind: input, shape index: {}]   ;;  %s1520_s3 = inlined_call_operand.vmem [shape: f32[4,32,32], index: 3, kind: input, shape index: {}]   ;;  %s1521_s4 = inlined_call_operand.vmem [shape: f32[4,32], index: 4, kind: input, shape index: {}]   ;;  %s1522_s5 = inlined_call_operand.hbm [shape: f32[4,32,32], index: 5, kind: input, shape index: {}]   ;;  %s1523_s6 = inlined_call_operand.vmem [shape: f32[4,32], index: 6, kind: input, shape index: {}]   ;;  %s1524_s7 = inlined_call_operand.hbm [shape: f32[4,32,32], index: 7, kind: input, shape index: {}]   ;;  %s1525_s8 = inlined_call_operand.hbm [shape: f32[4,32], index: 8, kind: input, shape index: {}]   ;;  %s1526_s9 = inlined_call_operand.hbm [shape: f32[4,32,32], index: 9, kind: input, shape index: {}]   ;;  %s1527_s10 = inlined_call_operand.vmem [shape: f32[4,32], index: 10, kind: input, shape index: {}]   ;;  %s1528_s11 = inlined_call_operand.vmem [shape: f32[4,32,8], index: 11, kind: input, shape index: {}]   ;;  %s1529_s12 = inlined_call_operand.hbm [shape: f32[4,8], index: 12, kind: input, shape index: {}]   ;;  %s1530_s13 = inlined_call_operand.hbm [shape: f32[8,8], index: 13, kind: output, shape index: {0}]   ;;  %s1531_s14 = inlined_call_operand.vmem [shape: f32[8,4], index: 14, kind: output, shape index: {1}]  }
   0x1   :  { %21 = vsyncpa [#allocation6], 0 }
   0x2   :  { %22 = vsyncpa [#allocation9], 0 }
   0x3   :  { %23 = vsyncpa [#allocation4], 0  ;;  %s53_s15 = sshll.u32 %s1524_s7, 4  ;;  %s1189_s16 = smov [#allocation5]   ;;  %s54_s15 = int_to_ptr.hbm [resolvable:$true] %s53_s15 }
   0x4   :  { %s55_s17 = sshll.u32 %s1189_s16, 4  ;;  %s77_s20 = sshll.u32 %s1526_s9, 4  ;;  %s56_s17 = int_to_ptr.vmem [resolvable:$true] %s55_s17  ;;  %s78_s20 = int_to_ptr.hbm [resolvable:$true] %s77_s20 }
   0x5   :  { %s1190_s21 = smov 128   ;;  %s1191_s22 = smov 8  }
   0x6   :  { %61 = dma.hbm_to_vmem [thread:$0]  %s54_s15, 2048, %s56_s17, [#allocation6], %s1190_s21, %s1190_s21, %s1191_s22  }
   0x7   :  { %s1192_s23 = smov [#allocation8]   ;;  %s38_s27 = sshll.u32 %s1522_s5, 4  ;;  %s39_s27 = int_to_ptr.hbm [resolvable:$true] %s38_s27 }
   0x8   :  { %s79_s24 = sshll.u32 %s1192_s23, 4  ;;  %s67_s29 = sshll.u32 %s1525_s8, 4  ;;  %s80_s24 = int_to_ptr.vmem [resolvable:$true] %s79_s24  ;;  %s68_s29 = int_to_ptr.hbm [resolvable:$true] %s67_s29 }
   0x9   :  { %85 = dma.hbm_to_vmem [thread:$0]  %s78_s20, 2048, %s80_s24, [#allocation9], %s1190_s21, %s1190_s21, %s1191_s22  }
   0xa   :  { %s1193_s30 = smov [#allocation2]   ;;  %s1194_s9 = smov [#allocation7]  }
   0xb   :  { %s40_s16 = sshll.u32 %s1193_s30, 4  ;;  %s69_s15 = sshll.u32 %s1194_s9, 4  ;;  %s41_s16 = int_to_ptr.vmem [resolvable:$true] %s40_s16  ;;  %s70_s15 = int_to_ptr.vmem [resolvable:$true] %s69_s15 }
   0xc   :  { %46 = dma.hbm_to_vmem [thread:$0]  %s39_s27, 2048, %s41_s16, [#allocation3], %s1190_s21, %s1190_s21, %s1191_s22  }
   0xd   :  { %s95_s19 = sshll.u32 %s1529_s12, 4  ;;  %s1195_s5 = smov [#allocation10]   ;;  %s96_s19 = int_to_ptr.hbm [resolvable:$true] %s95_s19 }
   0xe   :  { %72 = dma.hbm_to_vmem [thread:$0]  %s68_s29, 64, %s70_s15, [#allocation6]  }
   0xf   :  { %s97_s20 = sshll.u32 %s1195_s5, 4  ;;  %s98_s20 = int_to_ptr.vmem [resolvable:$true] %s97_s20 }
  0x10   :  { %100 = dma.hbm_to_vmem [thread:$0]  %s96_s19, 64, %s98_s20, [#allocation9]  }
  0x11   :  { %1181 = dma.done.wait [#allocation3], 2048  }
  0x12   :  { %1182 = vsyncadd [#allocation3], 4294965248 }
  0x13   :  { %1183 = dma.done.wait [#allocation6], 2112  }
  0x14   :  { %1184 = vsyncadd [#allocation6], 4294965184 }
  0x15   :  { %1185 = dma.done.wait [#allocation9], 2112  }
  0x16   :  { %1186 = vsyncadd [#allocation9], 4294965184  ;;  %vm129_vm0 = vcmask 1043456   ;;  %vm125_vm1 = vcmask 31744   ;;  %v122_v0 = vld [vmem:[%s1518_s1] sm:$0xf] }
  0x17   :  { %v1295_v1 = vld [vmem:[%s1517_s0] sm:$0xff]  ;;  %v157_v2 = vld [vmem:[%s1520_s3 + $0x18] sm:$0xff]  ;;  %932 = vmatpush.msk.msra.mxu0 %vm129_vm0, %v122_v0  ;;  %v156_v3 = vld [vmem:[%s1520_s3 + $0x10] sm:$0xff]  ;;  %vm160_vm2 = vcmask 261120   ;;  %s1196_s8 = smov 124   ;;  %s1198_s18 = smov [#allocation11]  }
  0x18   :  { %176 = vmatpush.msra.mxu1 %v157_v2  ;;  %933 = vmatmul.msk.f32.vlgmr.msra.gmra.mxu0 %vm125_vm1, %v1295_v1  ;;  %v155_v4 = vld [vmem:[%s1520_s3 + $0x8] sm:$0xff]  ;;  %v154_v5 = vld [vmem:[%s1520_s3] sm:$0xff]  ;;  %v188_v6 = vld [vmem:[#allocation2 + $0x18] sm:$0xff]  ;;  %s914_s19 = sshll.u32 %s1198_s18, 4  ;;  %s916_s20 = sshll.u32 %s1530_s13, 4  ;;  %vm906_vm3 = vcmask 64512   ;;  %s915_s19 = int_to_ptr.vmem [resolvable:$true] %s914_s19  ;;  %s917_s20 = int_to_ptr.hbm [resolvable:$true] %s916_s20 }
  0x19   :  { %206 = vmatpush.msra.mxu2 %v188_v6  ;;  %v997_v7 = vld [vmem:[%s1519_s2] ss:$0 sm:$0xff]  ;;  %v187_v11 = vld [vmem:[#allocation2 + $0x10] sm:$0xff]  ;;  %v186_v12 = vld [vmem:[#allocation2 + $0x8] sm:$0xff]  ;;  %307 = vrot.lane.b32.xlu0 %v1295_v1, %s1196_s8 }
  0x1a   :  { %177 = vmatpush.msra.mxu1 %v156_v3  ;;  %v185_v13 = vld [vmem:[#allocation2] sm:$0xff]  ;;  %v218_v14 = vld [vmem:[#allocation5 + $0x18] sm:$0xff]  ;;  %v217_v19 = vld [vmem:[#allocation5 + $0x10] sm:$0xff] }
  0x1b   :  { %207 = vmatpush.msra.mxu2 %v187_v11  ;;  %236 = vmatpush.msra.mxu3 %v218_v14  ;;  %v998_v15 = vld [vmem:[%s1521_s4] ss:$0 sm:$0xff]  ;;  %v216_v20 = vld [vmem:[#allocation5 + $0x8] sm:$0xff]  ;;  %v247_v23 = vld [vmem:[#allocation8 + $0x10] sm:$0xff] }
  0x1c   :  { %178 = vmatpush.msra.mxu1 %v155_v4  ;;  %v215_v21 = vld [vmem:[#allocation5] sm:$0xff]  ;;  %v246_v28 = vld [vmem:[#allocation8 + $0x8] sm:$0xff]  ;;  %v278_v30 = vld [vmem:[%s1528_s11 + $0x18] sm:$0xff] }
  0x1d   :  { %208 = vmatpush.msra.mxu2 %v186_v12  ;;  %237 = vmatpush.msra.mxu3 %v217_v19  ;;  %v248_v22 = vld [vmem:[#allocation8 + $0x18] sm:$0xff]  ;;  %v245_v29 = vld [vmem:[#allocation8] sm:$0xff]  ;;  %v277_v31 = vld [vmem:[%s1528_s11 + $0x10] sm:$0xff] }
  0x1e   :  { %179 = vmatpush.msra.mxu1 %v154_v5  ;;  %266 = vmatpush.msrb.mxu0 %v248_v22  ;;  %v999_v24 = vld [vmem:[%s1523_s6] ss:$0 sm:$0xff]  ;;  %v276_v36 = vld [vmem:[%s1528_s11 + $0x8] sm:$0xff]  ;;  %v939_v42 = vld [vmem:[%s1518_s1 + $0x4] sm:$0xf] }
  0x1f   :  { %209 = vmatpush.msra.mxu2 %v185_v13  ;;  %238 = vmatpush.msra.mxu3 %v216_v20  ;;  %v1000_v32 = vld [vmem:[#allocation7] ss:$0 sm:$0xff]  ;;  %v1002_v43 = vld [vmem:[#allocation10] ss:$0 sm:$0xff]  ;;  %v945_v46 = vld [vmem:[%s1520_s3 + $0x38] sm:$0xff] }
  0x20   :  { %267 = vmatpush.msrb.mxu0 %v247_v23  ;;  %296 = vmatpush.msrb.mxu1 %v278_v30  ;;  %v275_v37 = vld [vmem:[%s1528_s11] sm:$0xff]  ;;  %v944_v47 = vld [vmem:[%s1520_s3 + $0x30] sm:$0xff]  ;;  %v943_v55 = vld [vmem:[%s1520_s3 + $0x28] sm:$0xff] }
  0x21   :  { %239 = vmatpush.msra.mxu3 %v215_v21  ;;  %v1001_v38 = vld [vmem:[%s1527_s10] ss:$0 sm:$0xff]  ;;  %940 = vmatpush.msk.msrb.mxu2 %vm129_vm0, %v939_v42  ;;  %v383_v57 = vld [vmem:[#allocation2 + $0x38] sm:$0xff]  ;;  %v382_v58 = vld [vmem:[#allocation2 + $0x30] sm:$0xff] }
  0x22   :  { %268 = vmatpush.msrb.mxu0 %v246_v28  ;;  %297 = vmatpush.msrb.mxu1 %v277_v31  ;;  %v942_v56 = vld [vmem:[%s1520_s3 + $0x20] sm:$0xff]  ;;  %v381_v63 = vld [vmem:[#allocation2 + $0x28] sm:$0xff]  ;;  %v414_v2 = vld [vmem:[#allocation5 + $0x38] sm:$0xff] }
  0x23   :  { %370 = vmatpush.msrb.mxu3 %v945_v46  ;;  %v1003_v59 = vld [vmem:[%s1519_s2 + $0x1] ss:$0 sm:$0xff]  ;;  %v413_v3 = vld [vmem:[#allocation5 + $0x30] sm:$0xff]  ;;  %v955_v30 = vld [vmem:[%s1518_s1 + $0x8] sm:$0xf] }
  0x24   :  { %269 = vmatpush.msrb.mxu0 %v245_v29  ;;  %298 = vmatpush.msrb.mxu1 %v276_v36  ;;  %v380_v0 = vld [vmem:[#allocation2 + $0x20] sm:$0xff]  ;;  %v444_v11 = vld [vmem:[#allocation8 + $0x30] sm:$0xff]  ;;  %v959_v42 = vld [vmem:[%s1520_s3 + $0x48] sm:$0xff] }
  0x25   :  { %371 = vmatpush.msrb.mxu3 %v944_v47  ;;  %v1004_v4 = vld [vmem:[%s1521_s4 + $0x1] ss:$0 sm:$0xff]  ;;  %v952_v19 = vld [vmem:[%s1528_s11 + $0x30] sm:$0xff]  ;;  %v1008_v31 = vld [vmem:[#allocation10 + $0x1] ss:$0 sm:$0xff] }
  0x26   :  { %299 = vmatpush.msrb.mxu1 %v275_v37  ;;  %401 = vmatpush.msra.mxu0 %v383_v57  ;;  %v1005_v12 = vld [vmem:[%s1523_s6 + $0x1] ss:$0 sm:$0xff] }
  0x27   :  { %372 = vmatpush.msrb.mxu3 %v943_v55  ;;  %v1006_v20 = vld [vmem:[#allocation7 + $0x1] ss:$0 sm:$0xff]  ;;  %v1010_v55 = vld [vmem:[%s1521_s4 + $0x2] ss:$0 sm:$0xff] }
  0x28   :  { %402 = vmatpush.msra.mxu0 %v382_v58 }
  0x29   :  { %373 = vmatpush.msrb.mxu3 %v942_v56 }
  0x2a   :  { %403 = vmatpush.msra.mxu0 %v381_v63  ;;  %v1011_v63 = vld [vmem:[%s1523_s6 + $0x2] ss:$0 sm:$0xff] }
  0x2c   :  { %404 = vmatpush.msra.mxu0 %v380_v0 }
  0x8b   :  { %v308_v50 = vpop.permute.xlu0 %307 }
  0x95   :  { %v150_v8 = vpop.f32.mrf.mxu0 }
  0x96   :  { %v151_v9 = vadd.f32 %v997_v7, %v150_v8  ;;  %v412_v8 = vld [vmem:[#allocation5 + $0x28] sm:$0xff] }
  0x98   :  { %v153_v10 = vmax.f32 %v151_v9, 0.0  ;;  %v411_v9 = vld [vmem:[#allocation5 + $0x20] sm:$0xff] }
  0x9a   :  { %934 = vmatmul.msk.f32.vlgmr.msra.gmra.mxu1 %vm160_vm2, %v153_v10  ;;  %v445_v10 = vld [vmem:[#allocation8 + $0x38] sm:$0xff] }
  0x9b   :  { %432 = vmatpush.msra.mxu1 %v414_v2 }
  0x9d   :  { %433 = vmatpush.msra.mxu1 %v413_v3 }
  0x9f   :  { %434 = vmatpush.msra.mxu1 %v412_v8  ;;  %v1012_v8 = vld [vmem:[#allocation7 + $0x2] ss:$0 sm:$0xff] }
  0xa1   :  { %435 = vmatpush.msra.mxu1 %v411_v9 }
 0x117   :  { %v181_v16 = vpop.f32.mrf.mxu1 }
 0x118   :  { %v182_v17 = vadd.f32 %v998_v15, %v181_v16  ;;  %v443_v16 = vld [vmem:[#allocation8 + $0x28] sm:$0xff] }
 0x11a   :  { %v184_v18 = vmax.f32 %v182_v17, 0.0  ;;  %v442_v17 = vld [vmem:[#allocation8 + $0x20] sm:$0xff] }
 0x11c   :  { %935 = vmatmul.msk.f32.vlgmr.msra.gmra.mxu2 %vm160_vm2, %v184_v18  ;;  %v953_v18 = vld [vmem:[%s1528_s11 + $0x38] sm:$0xff] }
 0x11d   :  { %463 = vmatpush.msra.mxu2 %v445_v10 }
 0x11f   :  { %464 = vmatpush.msra.mxu2 %v444_v11 }
 0x121   :  { %465 = vmatpush.msra.mxu2 %v443_v16 }
 0x123   :  { %466 = vmatpush.msra.mxu2 %v442_v17 }
 0x19f   :  { %v211_v25 = vpop.f32.mrf.mxu2 }
 0x1a0   :  { %v212_v26 = vadd.f32 %v999_v24, %v211_v25  ;;  %v951_v24 = vld [vmem:[%s1528_s11 + $0x28] sm:$0xff]  ;;  %v950_v25 = vld [vmem:[%s1528_s11 + $0x20] sm:$0xff] }
 0x1a2   :  { %v214_v27 = vmax.f32 %v212_v26, 0.0  ;;  %v1007_v26 = vld [vmem:[%s1527_s10 + $0x1] ss:$0 sm:$0xff] }
 0x1a4   :  { %936 = vmatmul.msk.f32.vlgmr.msra.gmra.mxu3 %vm160_vm2, %v214_v27 }
 0x1a5   :  { %494 = vmatpush.msra.mxu3 %v953_v18  ;;  %v971_v18 = vld [vmem:[%s1518_s1 + $0xc] sm:$0xf] }
 0x1a7   :  { %495 = vmatpush.msra.mxu3 %v952_v19  ;;  %v1014_v19 = vld [vmem:[#allocation10 + $0x2] ss:$0 sm:$0xff] }
 0x1a9   :  { %496 = vmatpush.msra.mxu3 %v951_v24 }
 0x1ab   :  { %497 = vmatpush.msra.mxu3 %v950_v25  ;;  %v977_v25 = vld [vmem:[%s1520_s3 + $0x78] sm:$0xff] }
 0x227   :  { %v241_v33 = vpop.f32.mrf.mxu3 }
 0x228   :  { %v242_v34 = vadd.f32 %v1000_v32, %v241_v33 }
 0x22a   :  { %v244_v35 = vmax.f32 %v242_v34, 0.0  ;;  %v961_v34 = vld [vmem:[%s1520_s3 + $0x58] sm:$0xff] }
 0x22c   :  { %937 = vmatmul.msk.f32.vlgmr.msrb.gmra.mxu0 %vm160_vm2, %v244_v35  ;;  %v960_v35 = vld [vmem:[%s1520_s3 + $0x50] sm:$0xff] }
 0x22d   :  { %956 = vmatpush.msk.msrb.mxu0 %vm129_vm0, %v955_v30 }
 0x2a9   :  { %v271_v39 = vpop.f32.mrf.mxu0 }
 0x2aa   :  { %v272_v40 = vadd.f32 %v1001_v38, %v271_v39 }
 0x2ac   :  { %v274_v41 = vmax.f32 %v272_v40, 0.0 }
 0x2ae   :  { %938 = vmatmul.msk.f32.vlgmr.msrb.gmra.mxu1 %vm160_vm2, %v274_v41 }
 0x2af   :  { %565 = vmatpush.msrb.mxu1 %v961_v34  ;;  %v772_v34 = vld [vmem:[#allocation2 + $0x70] sm:$0xff] }
 0x2b1   :  { %566 = vmatpush.msrb.mxu1 %v960_v35 }
 0x2b3   :  { %567 = vmatpush.msrb.mxu1 %v959_v42  ;;  %v803_v42 = vld [vmem:[#allocation5 + $0x70] sm:$0xff] }
 0x32b   :  { %v301_v44 = vpop.f32.mrf.mxu1 }
 0x32c   :  { %v302_v45 = vadd.f32 %v1002_v43, %v301_v44  ;;  %v958_v43 = vld [vmem:[%s1520_s3 + $0x40] sm:$0xff]  ;;  %v578_v44 = vld [vmem:[#allocation2 + $0x58] sm:$0xff] }
 0x32d   :  { %568 = vmatpush.msrb.mxu1 %v958_v43  ;;  %v1016_v43 = vld [vmem:[%s1521_s4 + $0x3] ss:$0 sm:$0xff] }
 0x32e   :  { %312 = vrot.lane.b32.xlu0 %v302_v45, %s1196_s8  ;;  %1021 = vtanh.f32 %v302_v45  ;;  %v577_v45 = vld [vmem:[#allocation2 + $0x50] sm:$0xff] }
 0x334   :  { %v1354_v48 = vpop.eup %1021 }
 0x335   :  { %v305_v49 = vmul.f32 1.442695, %v1354_v48 }
 0x337   :  { %1023 = vpow2.f32 %v305_v49 }
 0x33d   :  { %v1024_v51 = vpop.eup %1023 }
 0x33e   :  { %v310_v52 = vmul.f32 %v1024_v51, %v308_v50  ;;  %v576_v50 = vld [vmem:[#allocation2 + $0x48] sm:$0xff]  ;;  %v575_v51 = vld [vmem:[#allocation2 + $0x40] sm:$0xff] }
 0x3a0   :  { %v313_v53 = vpop.permute.xlu0 %312 }
 0x3a1   :  { %v1357_v54 = vadd.f32 %v313_v53, %v310_v52  ;;  %v609_v52 = vld [vmem:[#allocation5 + $0x58] sm:$0xff]  ;;  %v608_v53 = vld [vmem:[#allocation5 + $0x50] sm:$0xff] }
 0x3a3   :  { %941 = vmatmul.msk.f32.vlgmr.msrb.gmra.mxu2 %vm125_vm1, %v1357_v54 }
 0x3a4   :  { %596 = vmatpush.msrb.mxu2 %v578_v44 }
 0x3a6   :  { %597 = vmatpush.msrb.mxu2 %v577_v45 }
 0x3a8   :  { %598 = vmatpush.msrb.mxu2 %v576_v50  ;;  %v834_v50 = vld [vmem:[#allocation8 + $0x70] sm:$0xff] }
 0x3aa   :  { %599 = vmatpush.msrb.mxu2 %v575_v51  ;;  %v1017_v51 = vld [vmem:[%s1523_s6 + $0x3] ss:$0 sm:$0xff] }
 0x426   :  { %v344_v60 = vpop.f32.mrf.mxu2 }
 0x427   :  { %v345_v61 = vadd.f32 %v1003_v59, %v344_v60  ;;  %v607_v59 = vld [vmem:[#allocation5 + $0x48] sm:$0xff]  ;;  %v606_v60 = vld [vmem:[#allocation5 + $0x40] sm:$0xff] }
 0x429   :  { %v347_v62 = vmax.f32 %v345_v61, 0.0  ;;  %v640_v61 = vld [vmem:[#allocation8 + $0x58] sm:$0xff] }
 0x42b   :  { %946 = vmatmul.msk.f32.vlgmr.msrb.gmra.mxu3 %vm160_vm2, %v347_v62  ;;  %v639_v62 = vld [vmem:[#allocation8 + $0x50] sm:$0xff] }
 0x42c   :  { %627 = vmatpush.msrb.mxu3 %v609_v52 }
 0x42e   :  { %628 = vmatpush.msrb.mxu3 %v608_v53 }
 0x430   :  { %629 = vmatpush.msrb.mxu3 %v607_v59  ;;  %v984_v59 = vld [vmem:[%s1528_s11 + $0x70] sm:$0xff] }
 0x432   :  { %630 = vmatpush.msrb.mxu3 %v606_v60  ;;  %v1018_v60 = vld [vmem:[#allocation7 + $0x3] ss:$0 sm:$0xff] }
 0x4ae   :  { %v375_v5 = vpop.f32.mrf.mxu3 }
 0x4af   :  { %v376_v6 = vadd.f32 %v1004_v4, %v375_v5  ;;  %v638_v4 = vld [vmem:[#allocation8 + $0x48] sm:$0xff]  ;;  %v637_v5 = vld [vmem:[#allocation8 + $0x40] sm:$0xff] }
 0x4b1   :  { %v378_v7 = vmax.f32 %v376_v6, 0.0  ;;  %v969_v6 = vld [vmem:[%s1528_s11 + $0x58] sm:$0xff] }
 0x4b3   :  { %947 = vmatmul.msk.f32.vlgmr.msra.gmra.mxu0 %vm160_vm2, %v378_v7  ;;  %v968_v7 = vld [vmem:[%s1528_s11 + $0x50] sm:$0xff] }
 0x4b4   :  { %658 = vmatpush.msra.mxu0 %v640_v61 }
 0x4b6   :  { %659 = vmatpush.msra.mxu0 %v639_v62 }
 0x4b8   :  { %660 = vmatpush.msra.mxu0 %v638_v4 }
 0x4ba   :  { %661 = vmatpush.msra.mxu0 %v637_v5 }
 0x530   :  { %v406_v13 = vpop.f32.mrf.mxu0 }
 0x531   :  { %v407_v14 = vadd.f32 %v1005_v12, %v406_v13  ;;  %v967_v12 = vld [vmem:[%s1528_s11 + $0x48] sm:$0xff]  ;;  %v966_v13 = vld [vmem:[%s1528_s11 + $0x40] sm:$0xff] }
 0x533   :  { %v409_v15 = vmax.f32 %v407_v14, 0.0  ;;  %v1013_v14 = vld [vmem:[%s1527_s10 + $0x2] ss:$0 sm:$0xff] }
 0x535   :  { %948 = vmatmul.msk.f32.vlgmr.msra.gmra.mxu1 %vm160_vm2, %v409_v15 }
 0x536   :  { %689 = vmatpush.msra.mxu1 %v969_v6 }
 0x538   :  { %690 = vmatpush.msra.mxu1 %v968_v7  ;;  %v1020_v7 = vld [vmem:[#allocation10 + $0x3] ss:$0 sm:$0xff] }
 0x53a   :  { %691 = vmatpush.msra.mxu1 %v967_v12 }
 0x53c   :  { %692 = vmatpush.msra.mxu1 %v966_v13 }
 0x5b2   :  { %v437_v21 = vpop.f32.mrf.mxu1 }
 0x5b3   :  { %v438_v22 = vadd.f32 %v1006_v20, %v437_v21 }
 0x5b5   :  { %v440_v23 = vmax.f32 %v438_v22, 0.0 }
 0x5b7   :  { %949 = vmatmul.msk.f32.vlgmr.msra.gmra.mxu2 %vm160_vm2, %v440_v23 }
 0x5b8   :  { %972 = vmatpush.msk.msra.mxu2 %vm129_vm0, %v971_v18 }
 0x63a   :  { %v468_v27 = vpop.f32.mrf.mxu2 }
 0x63b   :  { %v469_v28 = vadd.f32 %v1007_v26, %v468_v27  ;;  %v976_v26 = vld [vmem:[%s1520_s3 + $0x70] sm:$0xff] }
 0x63d   :  { %v471_v29 = vmax.f32 %v469_v28, 0.0 }
 0x63f   :  { %954 = vmatmul.msk.f32.vlgmr.msra.gmra.mxu3 %vm160_vm2, %v471_v29 }
 0x640   :  { %760 = vmatpush.msra.mxu3 %v977_v25 }
 0x642   :  { %761 = vmatpush.msra.mxu3 %v976_v26 }
 0x6c2   :  { %v499_v32 = vpop.f32.mrf.mxu3 }
 0x6c3   :  { %v500_v33 = vadd.f32 %v1008_v31, %v499_v32  ;;  %v975_v31 = vld [vmem:[%s1520_s3 + $0x68] sm:$0xff]  ;;  %v974_v32 = vld [vmem:[%s1520_s3 + $0x60] sm:$0xff] }
 0x6c4   :  { %762 = vmatpush.msra.mxu3 %v975_v31 }
 0x6c5   :  { %507 = vrot.lane.b32.xlu1 %v500_v33, %s1196_s8  ;;  %1025 = vtanh.f32 %v500_v33  ;;  %v773_v33 = vld [vmem:[#allocation2 + $0x78] sm:$0xff] }
 0x6c6   :  { %763 = vmatpush.msra.mxu3 %v974_v32 }
 0x6cb   :  { %v1407_v36 = vpop.eup %1025 }
 0x6cc   :  { %v503_v37 = vmul.f32 1.442695, %v1407_v36  ;;  %v511_v22 = vadd.f32 %v1407_v36, %v1354_v48 }
 0x6ce   :  { %1027 = vpow2.f32 %v503_v37 }
 0x6d4   :  { %v1028_v38 = vpop.eup %1027 }
 0x6d5   :  { %v505_v39 = vmul.f32 %v1028_v38, %v1295_v1  ;;  %v1009_v1 = vld [vmem:[%s1519_s2 + $0x2] ss:$0 sm:$0xff]  ;;  %v771_v38 = vld [vmem:[#allocation2 + $0x68] sm:$0xff] }
 0x737   :  { %v508_v40 = vpop.permute.xlu1 %507 }
 0x738   :  { %v1411_v41 = vadd.f32 %v508_v40, %v505_v39  ;;  %v770_v39 = vld [vmem:[#allocation2 + $0x60] sm:$0xff]  ;;  %v804_v40 = vld [vmem:[#allocation5 + $0x78] sm:$0xff] }
 0x73a   :  { %957 = vmatmul.msk.f32.vlgmr.msrb.gmra.mxu0 %vm125_vm1, %v1411_v41 }
 0x73b   :  { %791 = vmatpush.msrb.mxu0 %v773_v33 }
 0x73d   :  { %792 = vmatpush.msrb.mxu0 %v772_v34 }
 0x73f   :  { %793 = vmatpush.msrb.mxu0 %v771_v38 }
 0x741   :  { %794 = vmatpush.msrb.mxu0 %v770_v39 }
 0x7b7   :  { %v539_v46 = vpop.f32.mrf.mxu0 }
 0x7b8   :  { %v540_v47 = vadd.f32 %v1009_v1, %v539_v46  ;;  %v802_v46 = vld [vmem:[#allocation5 + $0x68] sm:$0xff] }
 0x7ba   :  { %v542_v49 = vmax.f32 %v540_v47, 0.0  ;;  %v801_v47 = vld [vmem:[#allocation5 + $0x60] sm:$0xff] }
 0x7bc   :  { %962 = vmatmul.msk.f32.vlgmr.msrb.gmra.mxu1 %vm160_vm2, %v542_v49  ;;  %v835_v49 = vld [vmem:[#allocation8 + $0x78] sm:$0xff] }
 0x7bd   :  { %822 = vmatpush.msrb.mxu1 %v804_v40 }
 0x7bf   :  { %823 = vmatpush.msrb.mxu1 %v803_v42 }
 0x7c1   :  { %824 = vmatpush.msrb.mxu1 %v802_v46 }
 0x7c3   :  { %825 = vmatpush.msrb.mxu1 %v801_v47 }
 0x839   :  { %v570_v56 = vpop.f32.mrf.mxu1 }
 0x83a   :  { %v571_v57 = vadd.f32 %v1010_v55, %v570_v56  ;;  %v833_v56 = vld [vmem:[#allocation8 + $0x68] sm:$0xff] }
 0x83c   :  { %v573_v58 = vmax.f32 %v571_v57, 0.0  ;;  %v832_v57 = vld [vmem:[#allocation8 + $0x60] sm:$0xff] }
 0x83e   :  { %963 = vmatmul.msk.f32.vlgmr.msrb.gmra.mxu2 %vm160_vm2, %v573_v58  ;;  %v985_v58 = vld [vmem:[%s1528_s11 + $0x78] sm:$0xff] }
 0x83f   :  { %853 = vmatpush.msrb.mxu2 %v835_v49 }
 0x841   :  { %854 = vmatpush.msrb.mxu2 %v834_v50 }
 0x843   :  { %855 = vmatpush.msrb.mxu2 %v833_v56 }
 0x845   :  { %856 = vmatpush.msrb.mxu2 %v832_v57 }
 0x8c1   :  { %v601_v0 = vpop.f32.mrf.mxu2 }
 0x8c2   :  { %v602_v2 = vadd.f32 %v1011_v63, %v601_v0  ;;  %v983_v0 = vld [vmem:[%s1528_s11 + $0x68] sm:$0xff] }
 0x8c4   :  { %v604_v3 = vmax.f32 %v602_v2, 0.0  ;;  %v982_v2 = vld [vmem:[%s1528_s11 + $0x60] sm:$0xff]  ;;  %s1197_s11 = smov 4  }
 0x8c6   :  { %964 = vmatmul.msk.f32.vlgmr.msrb.gmra.mxu3 %vm160_vm2, %v604_v3  ;;  %v1019_v3 = vld [vmem:[%s1527_s10 + $0x3] ss:$0 sm:$0xff] }
 0x8c7   :  { %884 = vmatpush.msrb.mxu3 %v985_v58 }
 0x8c9   :  { %885 = vmatpush.msrb.mxu3 %v984_v59 }
 0x8cb   :  { %886 = vmatpush.msrb.mxu3 %v983_v0 }
 0x8cd   :  { %887 = vmatpush.msrb.mxu3 %v982_v2 }
 0x949   :  { %v632_v9 = vpop.f32.mrf.mxu3 }
 0x94a   :  { %v633_v10 = vadd.f32 %v1012_v8, %v632_v9 }
 0x94c   :  { %v635_v11 = vmax.f32 %v633_v10, 0.0 }
 0x94e   :  { %965 = vmatmul.msk.f32.vlgmr.msra.gmra.mxu0 %vm160_vm2, %v635_v11 }
 0x9cb   :  { %v663_v15 = vpop.f32.mrf.mxu0 }
 0x9cc   :  { %v664_v16 = vadd.f32 %v1013_v14, %v663_v15 }
 0x9ce   :  { %v666_v17 = vmax.f32 %v664_v16, 0.0 }
 0x9d0   :  { %970 = vmatmul.msk.f32.vlgmr.msra.gmra.mxu1 %vm160_vm2, %v666_v17 }
 0xa4d   :  { %v694_v20 = vpop.f32.mrf.mxu1 }
 0xa4e   :  { %v695_v21 = vadd.f32 %v1014_v19, %v694_v20 }
 0xa50   :  { %1029 = vtanh.f32 %v695_v21  ;;  %702 = vrot.lane.b32.xlu1 %v695_v21, %s1196_s8 }
 0xa56   :  { %v1030_v23 = vpop.eup %1029 }
 0xa57   :  { %v1457_v24 = vadd.f32 %v1030_v23, %v511_v22  ;;  %v698_v27 = vmul.f32 1.442695, %v1030_v23 }
 0xa59   :  { %1031 = vpow2.f32 %v698_v27 }
 0xa5f   :  { %v1032_v28 = vpop.eup %1031 }
 0xa60   :  { %v700_v29 = vmul.f32 %v1032_v28, %v1357_v54  ;;  %v1015_v54 = vld [vmem:[%s1519_s2 + $0x3] ss:$0 sm:$0xff] }
 0xac2   :  { %v703_v30 = vpop.permute.xlu1 %702 }
 0xac3   :  { %v1466_v48 = vadd.f32 %v703_v30, %v700_v29 }
 0xac5   :  { %973 = vmatmul.msk.f32.vlgmr.msra.gmra.mxu2 %vm125_vm1, %v1466_v48 }
 0xb48   :  { %v734_v35 = vpop.f32.mrf.mxu2 }
 0xb49   :  { %v735_v36 = vadd.f32 %v1015_v54, %v734_v35 }
 0xb4b   :  { %v737_v37 = vmax.f32 %v735_v36, 0.0 }
 0xb4d   :  { %978 = vmatmul.msk.f32.vlgmr.msra.gmra.mxu3 %vm160_vm2, %v737_v37 }
 0xbd0   :  { %v765_v44 = vpop.f32.mrf.mxu3 }
 0xbd1   :  { %v766_v45 = vadd.f32 %v1016_v43, %v765_v44 }
 0xbd3   :  { %v768_v1 = vmax.f32 %v766_v45, 0.0 }
 0xbd5   :  { %979 = vmatmul.msk.f32.vlgmr.msrb.gmra.mxu0 %vm160_vm2, %v768_v1 }
 0xc52   :  { %v796_v52 = vpop.f32.mrf.mxu0 }
 0xc53   :  { %v797_v53 = vadd.f32 %v1017_v51, %v796_v52 }
 0xc55   :  { %v799_v55 = vmax.f32 %v797_v53, 0.0 }
 0xc57   :  { %980 = vmatmul.msk.f32.vlgmr.msrb.gmra.mxu1 %vm160_vm2, %v799_v55 }
 0xcd4   :  { %v827_v61 = vpop.f32.mrf.mxu1 }
 0xcd5   :  { %v828_v62 = vadd.f32 %v1018_v60, %v827_v61 }
 0xcd7   :  { %v830_v63 = vmax.f32 %v828_v62, 0.0 }
 0xcd9   :  { %981 = vmatmul.msk.f32.vlgmr.msrb.gmra.mxu2 %vm160_vm2, %v830_v63 }
 0xd5c   :  { %v858_v4 = vpop.f32.mrf.mxu2 }
 0xd5d   :  { %v859_v5 = vadd.f32 %v1019_v3, %v858_v4 }
 0xd5f   :  { %v861_v6 = vmax.f32 %v859_v5, 0.0 }
 0xd61   :  { %986 = vmatmul.msk.f32.vlgmr.msrb.gmra.mxu3 %vm160_vm2, %v861_v6 }
 0xde4   :  { %v889_v8 = vpop.f32.mrf.mxu3 }
 0xde5   :  { %v890_v9 = vadd.f32 %v1020_v7, %v889_v8 }
 0xde7   :  { %1033 = vtanh.f32 %v890_v9  ;;  %897 = vrot.lane.b32.xlu2 %v890_v9, %s1196_s8 }
 0xded   :  { %v1034_v10 = vpop.eup %1033 }
 0xdee   :  { %v901_v11 = vadd.f32 %v1034_v10, %v1457_v24  ;;  %v893_v12 = vmul.f32 1.442695, %v1034_v10 }
 0xdef   :  { %902 = vrot.lane.b32.xlu2 %v1466_v48, %s1197_s11 }
 0xdf0   :  { %908 = vst.msk [vmem:[%s1531_s14] sm:$0xff] %vm125_vm1, %v901_v11  ;;  %1035 = vpow2.f32 %v893_v12 }
 0xdf6   :  { %v1036_v14 = vpop.eup %1035 }
 0xdf7   :  { %v895_v15 = vmul.f32 %v1036_v14, %v1411_v41 }
 0xe41   :  { %v898_v13 = vpop.permute.xlu2 %897 }
 0xe42   :  { %v900_v16 = vadd.f32 %v898_v13, %v895_v15 }
 0xe49   :  { %v903_v17 = vpop.permute.xlu2 %902 }
 0xe4a   :  { %v905_v18 = vsel %vm125_vm1, %v900_v16, %v903_v17 }
 0xe4b   :  { %907 = vst.msk [vmem:[#allocation11] sm:$0xff] %vm906_vm3, %v905_v18 }
 0xe4c   :  { %919 = dma.vmem_to_hbm [thread:$0]  %s915_s19, 128, %s917_s20, [#allocation4]  }
 0xe4d   :  { %1187 = dma.done.wait [#allocation4], 128  }
 0xe4e   :  { %1188 = vsyncadd [#allocation4], 4294967168 }
 0xe4f   :  { %928 = vsyncpa [#allocation3], 1 }
 0xe50   :  { %929 = vsyncpa [#allocation6], 1 }
 0xe51   :  { %930 = vsyncpa [#allocation9], 1 }
 0xe52   :  { %931 = vsyncpa [#allocation4], 1 }

</bundles_post_ra>
